<compile_context>
chip_gen: v5e
topology: v5e:2x2
jax: 0.10.0
libtpu: 0.0.40
codegen_flags: <defaults>
</compile_context>

<pallas_src>
import jax
import jax.numpy as jnp
from jax.experimental import pallas as pl
from jax.experimental.pallas import tpu as pltpu

CHUNK = 128            # inner strip-mine width == lane width
HID = 40               # hidden size of the MLP


def mlp_kernel(x_ref, w1_ref, b1_ref, w2_ref, b2_ref, w3_ref, b3_ref, o_ref):
    """One batch tile.  Batch on lanes, features on sublanes.

    x_ref : [1, block_b]   input values spread across lanes
    w1_ref: [HID, CHUNK]   l1 weight column pre-broadcast to lane width
    b1_ref: [HID, CHUNK]   l1 bias, pre-broadcast
    w2_ref: [HID, HID]     l2 weight (torch [out, in]); h2 = W2 @ h1
    b2_ref: [HID, CHUNK]   l2 bias, pre-broadcast
    w3_ref: [HID, CHUNK]   l3 weight column, pre-broadcast
    b3_ref: [1, 1]         l3 bias (scalar, SMEM)
    o_ref : [1, block_b]   lane-dense output
    """
    n_chunks = x_ref.shape[1] // CHUNK

    w1 = w1_ref[...]
    b1 = b1_ref[...]
    w2 = w2_ref[...]
    b2 = b2_ref[...]
    w3 = w3_ref[...]
    b3 = b3_ref[0, 0]

    # Strip-mine the tile in 128-lane chunks: per-chunk intermediates are
    # [HID, 128] (5 vregs each) so even large block_b never spills.  The trip
    # count is static -> full unroll; slices are static -> zero-cost views.
    for c in range(n_chunks):
        x = x_ref[:, c * CHUNK:(c + 1) * CHUNK]                    # [1, CHUNK]

        # Layer 1: Linear(1, 40). K=1 contraction == broadcast mul -> VPU only.
        h1 = jnp.maximum(w1 * x + b1, 0.0)                         # [HID, CHUNK]

        # Layer 2: Linear(40, 40). The only real contraction -> MXU; batch
        # stays on the lane (N) axis of the result.
        h2 = jnp.dot(w2, h1, preferred_element_type=jnp.float32) + b2
        h2 = jnp.maximum(h2, 0.0)                                  # [HID, CHUNK]

        # Layer 3: Linear(40, 1). N=1 matmul -> VPU mul + sublane (XLU) reduce.
        o_ref[:, c * CHUNK:(c + 1) * CHUNK] = (
            jnp.sum(w3 * h2, axis=0, keepdims=True) + b3)          # [1, CHUNK]


def _choose_block_b(B, target_block_b):
    """Biggest tile <= target that still leaves >= 2 grid steps (v7x megacore)
    whenever the batch spans >= 2 lane chunks."""
    n_chunks = pl.cdiv(B, CHUNK)
    max_chunks_per_block = pl.cdiv(n_chunks, 2) if n_chunks >= 2 else 1
    chunks_per_block = max(1, min(target_block_b // CHUNK, max_chunks_per_block))
    return chunks_per_block * CHUNK


def mlp_forward(x, kp, *, target_block_b=512):
    """x: [B, 1] float32.  kp: prepare_kernel_params(...) output.
    Returns [B, 1] float32 (== torch MLP.forward)."""
    B = x.shape[0]
    block_b = _choose_block_b(B, target_block_b)
    nb = pl.cdiv(B, block_b)
    Bp = nb * block_b

    # [B,1] -> [1,B] is a free reshape of contiguous data.  Pad only when the
    # batch is not a multiple of the tile (tail tile only); padded lanes
    # produce garbage through the MLP and are sliced off below.
    xt = x.astype(jnp.float32).reshape(1, B)
    if Bp != B:
        xt = jnp.pad(xt, ((0, 0), (0, Bp - B)))

    def resident(shape):
        # Weight / bias stays in the same VMEM block for every grid step.
        return pl.BlockSpec(shape, lambda i: (0, 0))

    weight_bytes = 4 * (4 * HID * CHUNK + HID * HID + 1)
    out = pl.pallas_call(
        mlp_kernel,
        out_shape=jax.ShapeDtypeStruct((1, Bp), jnp.float32),
        grid=(nb,),
        in_specs=[
            pl.BlockSpec((1, block_b), lambda i: (0, i)),   # x batch tile
            resident((HID, CHUNK)),                         # w1 (pre-broadcast)
            resident((HID, CHUNK)),                         # b1
            resident((HID, HID)),                           # w2 (torch [out,in])
            resident((HID, CHUNK)),                         # b2
            resident((HID, CHUNK)),                         # w3 (pre-broadcast)
            pl.BlockSpec(memory_space=pltpu.MemorySpace.SMEM),  # b3 scalar
        ],
        out_specs=pl.BlockSpec((1, block_b), lambda i: (0, i)),
        compiler_params=pltpu.CompilerParams(
            dimension_semantics=("parallel",)),
        cost_estimate=pl.CostEstimate(
            flops=2 * HID * (HID + 2) * Bp,
            transcendentals=0,
            bytes_accessed=8 * Bp + weight_bytes),
    )(xt, kp["w1b"], kp["b1b"], kp["w2"], kp["b2b"], kp["w3b"], kp["b3"])

    out = out.reshape(Bp, 1)           # free reshape
    return out if Bp == B else out[:B]


def init_params(key):
    """Deterministic init matching torch.nn.Linear's U(-1/sqrt(fan_in), ...),
    stored in the torch [out, in] layout."""
    ks = jax.random.split(key, 6)

    def u(k, shape, fan_in):
        bound = 1.0 / jnp.sqrt(fan_in)
        return jax.random.uniform(k, shape, jnp.float32, -bound, bound)

    return {
        "w1": u(ks[0], (HID, 1), 1.0),   "b1": u(ks[1], (HID,), 1.0),
        "w2": u(ks[2], (HID, HID), 40.0), "b2": u(ks[3], (HID,), 40.0),
        "w3": u(ks[4], (1, HID), 40.0),  "b3": u(ks[5], (1,), 40.0),
    }


def prepare_kernel_params(p):
    """One-time host-side layout prep: columnize + pre-broadcast the small
    operands to lane width so the kernel never does per-step lane broadcasts."""
    return {
        "w1b": jnp.broadcast_to(p["w1"], (HID, CHUNK)),
        "b1b": jnp.broadcast_to(p["b1"][:, None], (HID, CHUNK)),
        "w2": p["w2"],
        "b2b": jnp.broadcast_to(p["b2"][:, None], (HID, CHUNK)),
        "w3b": jnp.broadcast_to(p["w3"].T, (HID, CHUNK)),
        "b3": p["b3"].reshape(1, 1),
    }


def mlp_reference(x, p):
    """Plain-JAX reference with standard torch.nn.Linear semantics."""
    h1 = jnp.maximum(x @ p["w1"].T + p["b1"], 0.0)   # [B, 40]
    h2 = jnp.maximum(h1 @ p["w2"].T + p["b2"], 0.0)  # [B, 40]
    return h2 @ p["w3"].T + p["b3"]                  # [B, 1]


if __name__ == "__main__":
    key = jax.random.PRNGKey(0)
    pkey, xkey1, xkey2 = jax.random.split(key, 3)
    params = init_params(pkey)
    kparams = prepare_kernel_params(params)

    # Case 1: non-multiple-of-128 batch -> padded tail tile, block_b=128, nb=2.
    B1 = 200
    x1 = jax.random.normal(xkey1, (B1, 1), jnp.float32)
    out1 = jax.block_until_ready(mlp_forward(x1, kparams))
    ref1 = mlp_reference(x1, params)
    assert out1.shape == (B1, 1)
    assert jnp.allclose(out1, ref1, atol=1e-5, rtol=1e-5), "mismatch (B=200)"

    # Case 2: multiple-of-tile batch -> no pad/copy, block_b=512 (4-chunk
    # strip-mined tile), nb=2 grid steps.
    B2 = 1024
    x2 = jax.random.normal(xkey2, (B2, 1), jnp.float32)
    out2 = jax.block_until_ready(mlp_forward(x2, kparams))
    ref2 = mlp_reference(x2, params)
    assert out2.shape == (B2, 1)
    assert jnp.allclose(out2, ref2, atol=1e-5, rtol=1e-5), "mismatch (B=1024)"

    print("KERNEL_OK")
</pallas_src>

<mosaic_0001>
module attributes {stable_mosaic.version = 11 : i64} {
  func.func @mlp_kernel(%arg0: i32, %arg1: memref<1x128xf32, #tpu.memory_space<vmem>>, %arg2: memref<40x128xf32, #tpu.memory_space<vmem>>, %arg3: memref<40x128xf32, #tpu.memory_space<vmem>>, %arg4: memref<40x40xf32, #tpu.memory_space<vmem>>, %arg5: memref<40x128xf32, #tpu.memory_space<vmem>>, %arg6: memref<40x128xf32, #tpu.memory_space<vmem>>, %arg7: memref<1x1xf32, #tpu.memory_space<smem>>, %arg8: memref<1x128xf32, #tpu.memory_space<vmem>>) attributes {dimension_semantics = [#tpu.dimension_semantics<parallel>], iteration_bounds = array<i64: 2>, scalar_prefetch = 0 : i64, scratch_operands = 0 : i64, tpu.core_type = #tpu.core_type<tc>, window_params = [{transform_indices = @transform_0, window_bounds = array<i64: 1, 128>}, {pipeline_mode = #tpu.pipeline_mode<synchronous>, transform_indices = @transform_1, window_bounds = array<i64: 40, 128>}, {pipeline_mode = #tpu.pipeline_mode<synchronous>, transform_indices = @transform_2, window_bounds = array<i64: 40, 128>}, {pipeline_mode = #tpu.pipeline_mode<synchronous>, transform_indices = @transform_3, window_bounds = array<i64: 40, 40>}, {pipeline_mode = #tpu.pipeline_mode<synchronous>, transform_indices = @transform_4, window_bounds = array<i64: 40, 128>}, {pipeline_mode = #tpu.pipeline_mode<synchronous>, transform_indices = @transform_5, window_bounds = array<i64: 40, 128>}, {transform_indices = @transform_6, window_bounds = array<i64: 1, 1>}, {transform_indices = @transform_7, window_bounds = array<i64: 1, 128>}]} {
    %c0 = arith.constant 0 : index
    %c0_0 = arith.constant 0 : index
    %0 = vector.load %arg2[%c0, %c0_0] : memref<40x128xf32, #tpu.memory_space<vmem>>, vector<40x128xf32>
    %c0_1 = arith.constant 0 : index
    %c0_2 = arith.constant 0 : index
    %1 = vector.load %arg3[%c0_1, %c0_2] : memref<40x128xf32, #tpu.memory_space<vmem>>, vector<40x128xf32>
    %c0_3 = arith.constant 0 : index
    %c0_4 = arith.constant 0 : index
    %2 = vector.load %arg4[%c0_3, %c0_4] : memref<40x40xf32, #tpu.memory_space<vmem>>, vector<40x40xf32>
    %c0_5 = arith.constant 0 : index
    %c0_6 = arith.constant 0 : index
    %3 = vector.load %arg5[%c0_5, %c0_6] : memref<40x128xf32, #tpu.memory_space<vmem>>, vector<40x128xf32>
    %c0_7 = arith.constant 0 : index
    %c0_8 = arith.constant 0 : index
    %4 = vector.load %arg6[%c0_7, %c0_8] : memref<40x128xf32, #tpu.memory_space<vmem>>, vector<40x128xf32>
    %c0_9 = arith.constant 0 : index
    %c0_10 = arith.constant 0 : index
    %5 = memref.load %arg7[%c0_9, %c0_10] : memref<1x1xf32, #tpu.memory_space<smem>>
    %c0_11 = arith.constant 0 : index
    %c0_12 = arith.constant 0 : index
    %6 = vector.load %arg1[%c0_11, %c0_12] : memref<1x128xf32, #tpu.memory_space<vmem>>, vector<1x128xf32>
    %7 = vector.broadcast %6 : vector<1x128xf32> to vector<40x128xf32>
    %8 = arith.mulf %0, %7 : vector<40x128xf32>
    %9 = arith.addf %8, %1 : vector<40x128xf32>
    %cst = arith.constant 0.000000e+00 : f32
    %10 = vector.broadcast %cst : f32 to vector<40x128xf32>
    %11 = arith.maximumf %9, %10 : vector<40x128xf32>
    %cst_13 = arith.constant dense<0.000000e+00> : vector<40x128xf32>
    %12 = tpu.matmul %2, %11, %cst_13 {dimension_numbers = #tpu.dot_dimension_numbers<[1], [0], [0], [1], [0, 0, 1, 1], [], []>} : vector<40x40xf32>, vector<40x128xf32>, vector<40x128xf32> -> vector<40x128xf32>
    %13 = arith.addf %12, %3 : vector<40x128xf32>
    %cst_14 = arith.constant 0.000000e+00 : f32
    %14 = vector.broadcast %cst_14 : f32 to vector<40x128xf32>
    %15 = arith.maximumf %13, %14 : vector<40x128xf32>
    %16 = arith.mulf %4, %15 : vector<40x128xf32>
    %cst_15 = arith.constant dense<0.000000e+00> : vector<128xf32>
    %17 = vector.multi_reduction <add>, %16, %cst_15 [0] : vector<40x128xf32> to vector<128xf32>
    %18 = vector.shape_cast %17 : vector<128xf32> to vector<1x128xf32>
    %19 = vector.broadcast %5 : f32 to vector<1x128xf32>
    %20 = arith.addf %18, %19 : vector<1x128xf32>
    %c0_16 = arith.constant 0 : index
    %c0_17 = arith.constant 0 : index
    %21 = vector.load %arg8[%c0_16, %c0_17] : memref<1x128xf32, #tpu.memory_space<vmem>>, vector<1x128xf32>
    tpu.vector_store %arg8[%c0_16, %c0_17], %20 {strides = array<i32>} : memref<1x128xf32, #tpu.memory_space<vmem>>, vector<1x128xf32>,
    return
  }
  func.func @transform_0(%arg0: i32) -> (i32, i32) {
    %c0_i32 = arith.constant 0 : i32
    %c0_i32_0 = arith.constant 0 : i32
    return %c0_i32, %arg0 : i32, i32
  }
  func.func @transform_1(%arg0: i32) -> (i32, i32) {
    %c0_i32 = arith.constant 0 : i32
    %c0_i32_0 = arith.constant 0 : i32
    %c0_i32_1 = arith.constant 0 : i32
    return %c0_i32, %c0_i32_0 : i32, i32
  }
  func.func @transform_2(%arg0: i32) -> (i32, i32) {
    %c0_i32 = arith.constant 0 : i32
    %c0_i32_0 = arith.constant 0 : i32
    %c0_i32_1 = arith.constant 0 : i32
    return %c0_i32, %c0_i32_0 : i32, i32
  }
  func.func @transform_3(%arg0: i32) -> (i32, i32) {
    %c0_i32 = arith.constant 0 : i32
    %c0_i32_0 = arith.constant 0 : i32
    %c0_i32_1 = arith.constant 0 : i32
    return %c0_i32, %c0_i32_0 : i32, i32
  }
  func.func @transform_4(%arg0: i32) -> (i32, i32) {
    %c0_i32 = arith.constant 0 : i32
    %c0_i32_0 = arith.constant 0 : i32
    %c0_i32_1 = arith.constant 0 : i32
    return %c0_i32, %c0_i32_0 : i32, i32
  }
  func.func @transform_5(%arg0: i32) -> (i32, i32) {
    %c0_i32 = arith.constant 0 : i32
    %c0_i32_0 = arith.constant 0 : i32
    %c0_i32_1 = arith.constant 0 : i32
    return %c0_i32, %c0_i32_0 : i32, i32
  }
  func.func @transform_6(%arg0: i32) -> (i32, i32) {
    %c0_i32 = arith.constant 0 : i32
    %c0_i32_0 = arith.constant 0 : i32
    %c0_i32_1 = arith.constant 0 : i32
    return %c0_i32, %c0_i32_0 : i32, i32
  }
  func.func @transform_7(%arg0: i32) -> (i32, i32) {
    %c0_i32 = arith.constant 0 : i32
    %c0_i32_0 = arith.constant 0 : i32
    return %c0_i32, %arg0 : i32, i32
  }
}

</mosaic_0001>

<bundles_post_ra>
// kernel: tpu_custom_call.1
= control target key start
LH: loop header
LB: loop body
LE: loop exit
PB: predicated region body
PF: predicated region fallthrough
CT: control target
= control target key end

     0   :  { %s1127_s0 = inlined_call_operand.vmem [shape: f32[1,256], index: 0, kind: input, shape index: {}]   ;;  %s1128_s1 = inlined_call_operand.hbm [shape: f32[40,128], index: 1, kind: input, shape index: {}]   ;;  %s1129_s2 = inlined_call_operand.hbm [shape: f32[40,128], index: 2, kind: input, shape index: {}]   ;;  %s1130_s3 = inlined_call_operand.hbm [shape: f32[40,40], index: 3, kind: input, shape index: {}]   ;;  %s1131_s4 = inlined_call_operand.hbm [shape: f32[40,128], index: 4, kind: input, shape index: {}]   ;;  %s1132_s5 = inlined_call_operand.hbm [shape: f32[40,128], index: 5, kind: input, shape index: {}]   ;;  %s1133_s6 = inlined_call_operand.<no memory space> [shape: f32[1,1], index: 6, kind: input, shape index: {}]   ;;  %s1134_s7 = inlined_call_operand.hbm [shape: f32[1,256], index: 7, kind: output, shape index: {}]  }
   0x1   :  { %1135 = sst [smem:[#allocation17_spill]] %s1129_s2 }
   0x2   :  { %1136 = sst [smem:[#allocation18_spill]] %s1131_s4 }
   0x3   :  { %12 = sst [smem:[#allocation2]] %s1133_s6 }
   0x4   :  { %13 = vsyncpa [#allocation4], 0 }
   0x5   :  { %14 = vsyncpa [#allocation7], 0 }
   0x6   :  { %15 = vsyncpa [#allocation10], 0 }
   0x7   :  { %16 = vsyncpa [#allocation5], 0 }
   0x8   :  { %18 = vsyncpa [#allocation5 + $0x1], 0  ;;  %s990_s26 = smov 0   ;;  %s992_s27 = smov 0  }
   0x9   :  { %s994_s28 = smov 0   ;;  %s996_s29 = smov 0  }
   0xa LB: > { %s1011_s6 = sadd.s32 4294967295, %s938_s29   ;;  %s585_s30 = sadd.s32 4294967294, %s938_s29   ;;  %s938_s29 = sphi %s996_s29, %s1146_s29   ;;  %s934_s28 = sphi %s994_s28, %s1145_s28   ;;  %s930_s27 = sphi %s992_s27, %s1144_s27   ;;  %s926_s26 = sphi %s990_s26, %s1143_s26  }
   0xb   : > { %s1015_s8 = sadd.s32 1, %s938_s29   ;;  %s183_s9 = sadd.s32 1, %s934_s28 }
   0xc   : > { %s180_s10 = ssub.s32 %s938_s29, %s1015_s8  ;;  %p193_p0 = scmp.ne.s32.totalorder %s934_s28, %s930_s27 }
   0xd   : > { %p181_p1 = scmp.eq.s32.totalorder %s180_s10, 0  ;;  %p194_p2 = scmp.eq.s32.totalorder %s1011_s6, 1 }
   0xe   : > { %p199_p3 = scmp.ne.s32.totalorder %s930_s27, %s926_s26  ;;  %p200_p4 = scmp.eq.s32.totalorder %s585_s30, 1 }
   0xf   : > { %s1026_s11 = scalar_select %p181_p1, %s934_s28, %s183_s9  }
  0x10   : > { %p1028_p5 = por %p194_p2, %p193_p0  ;;  %p1032_p6 = por %p200_p4, %p199_p3 }
  0x11   : > { %p586_p7 = scmp.ge.s32.totalorder %s938_s29, 1  ;;  %p207_p8 = scmp.lt.s32.totalorder %s938_s29, 3 }
  0x12   : > { %p663_p9 = scmp.eq.s32.totalorder %s1011_s6, 0  ;;  %s1140_s2 = sld [smem:[#allocation17_spill]] }
  0x13   : > { %p1039_p10 = pnand %p586_p7, %p207_p8  ;;  %s1141_s4 = sld [smem:[#allocation18_spill]] }
  0x14   : > { %s940_s22 = smov [#allocation6]   ;;  %s941_s24 = smov 128  }
  0x15   : > { %p643_p11 = pneg %p1039_p10  ;;  %s234_s23 = sshll.u32 %s940_s22, 4  ;;  %s235_s23 = int_to_ptr.vmem [resolvable:$true] %s234_s23 }
  0x16   : > { %s942_s25 = smov 8   ;;  %s943_s30 = smov [#allocation9]  }
  0x17   : > { %p1053_p12 = pnand %p663_p9, %p643_p11  ;;  %s262_s9 = sshll.u32 %s943_s30, 4  ;;  %s263_s9 = int_to_ptr.vmem [resolvable:$true] %s262_s9 }
  0x18   : > { %s232_s17 = sshll.u32 %s1140_s2, 4  ;;  %s218_s16 = sshll.u32 %s1128_s1, 4  ;;  %s233_s17 = int_to_ptr.hbm [resolvable:$true] %s232_s17  ;;  %s219_s16 = int_to_ptr.hbm [resolvable:$true] %s218_s16 }
  0x19   : > { %s260_s20 = sshll.u32 %s1141_s4, 4  ;;  %s246_s22 = sshll.u32 %s1130_s3, 4  ;;  %s261_s20 = int_to_ptr.hbm [resolvable:$true] %s260_s20  ;;  %s247_s22 = int_to_ptr.hbm [resolvable:$true] %s246_s22 }
  0x1a   : > { %649 = dma.hbm_to_vmem [thread:$0]  (!%p1053_p12), %s233_s17, 640, %s235_s23, [#allocation7], %s941_s24, %s941_s24, %s942_s25  }
  0x1b   : > { %655 = dma.hbm_to_vmem [thread:$0]  (!%p1053_p12), %s261_s20, 640, %s263_s9, [#allocation10], %s941_s24, %s941_s24, %s942_s25  }
  0x1c   : > { %s944_s2 = smov [#allocation3]   ;;  %s945_s17 = smov [#allocation8]  }
  0x1d   : > { %s220_s4 = sshll.u32 %s944_s2, 4  ;;  %s248_s23 = sshll.u32 %s945_s17, 4  ;;  %s221_s4 = int_to_ptr.vmem [resolvable:$true] %s220_s4  ;;  %s249_s23 = int_to_ptr.vmem [resolvable:$true] %s248_s23 }
  0x1e   : > { %646 = dma.hbm_to_vmem [thread:$0]  (!%p1053_p12), %s219_s16, 640, %s221_s4, [#allocation4], %s941_s24, %s941_s24, %s942_s25  }
  0x1f   : > { %s274_s15 = sshll.u32 %s1132_s5, 4  ;;  %s946_s20 = smov [#allocation11]   ;;  %s275_s15 = int_to_ptr.hbm [resolvable:$true] %s274_s15 }
  0x20   : > { %652 = dma.hbm_to_vmem [thread:$0]  (!%p1053_p12), %s247_s22, 640, %s249_s23, [#allocation7], %s941_s24, %s941_s24, %s942_s25  }
  0x21   : > { %s276_s9 = sshll.u32 %s946_s20, 4  ;;  %301 = sbr.rel (%p1039_p10) target bundleno = 229 (0xe5), region = 48  ;;  %s277_s9 = int_to_ptr.vmem [resolvable:$true] %s276_s9 }
  0x22   : > { %658 = dma.hbm_to_vmem [thread:$0]  (!%p1053_p12), %s275_s15, 640, %s277_s9, [#allocation10], %s941_s24, %s941_s24, %s942_s25  }
  0x26   : > { %909 = dma.done.wait (%p663_p9), [#allocation4], 640  }
  0x27   : > { %911 = vsyncadd (%p663_p9), [#allocation4], 4294966656 }
  0x28   : > { %913 = dma.done.wait (%p663_p9), [#allocation7], 1280  }
  0x29   : > { %915 = vsyncadd (%p663_p9), [#allocation7], 4294966016 }
  0x2a   : > { %917 = dma.done.wait (%p663_p9), [#allocation10], 1280  }
  0x2b   : > { %919 = vsyncadd (%p663_p9), [#allocation10], 4294966016  ;;  %p351_p13 = scmp.lt.s32.totalorder %s1011_s6, 1  ;;  %v358_v0 = vld [vmem:[#allocation3 + $0x20] sm:$0xff]  ;;  %v363_v1 = vld [vmem:[#allocation6 + $0x20] sm:$0xff]  ;;  %vm399_vm0 = vcmask 326656   ;;  %s479_s19 = scalar_lea.hbm %s1134_s7, %s1011_s6 }
  0x2c   : > { %v357_v3 = vld [vmem:[#allocation3 + $0x18] sm:$0xff]  ;;  %v362_v4 = vld [vmem:[#allocation6 + $0x18] sm:$0xff]  ;;  %v356_v5 = vld [vmem:[#allocation3 + $0x10] sm:$0xff]  ;;  %s379_s24 = sld [smem:[#allocation2]]  ;;  %s349_s25 = sand.u32 1, %s930_s27  }
  0x2d   : > { %s352_s2 = scalar_select %p351_p13, %s1011_s6, 1  ;;  %v361_v6 = vld [vmem:[#allocation6 + $0x10] sm:$0xff]  ;;  %v355_v7 = vld [vmem:[#allocation3 + $0x8] sm:$0xff]  ;;  %v354_v12 = vld [vmem:[#allocation3] sm:$0xff] }
  0x2e   : > { %v360_v13 = vld [vmem:[#allocation6 + $0x8] sm:$0xff]  ;;  %v359_v18 = vld [vmem:[#allocation6] sm:$0xff]  ;;  %v366_v26 = vld [vmem:[#allocation8 + $0x10] sm:$0xff]  ;;  %s350_s22 = scalar_lea.vmem [#allocation12], %s349_s25  ;;  %s483_s23 = sshll.u32 %s479_s19, 4  ;;  %s484_s23 = int_to_ptr.hbm [resolvable:$true] %s483_s23 }
  0x2f   : > { %s353_s21 = scalar_lea.vmem %s1127_s0, %s352_s2  ;;  %v367_v27 = vld [vmem:[#allocation8 + $0x18] sm:$0xff]  ;;  %v364_v28 = vld [vmem:[#allocation8] sm:$0xff]  ;;  %v365_v29 = vld [vmem:[#allocation8 + $0x8] sm:$0xff]  ;;  %s481_s17 = sshll.u32 %s350_s22, 4  ;;  %s482_s17 = int_to_ptr.vmem [resolvable:$true] %s481_s17 }
  0x30   : > { %v713_v2 = vld [vmem:[%s353_s21] ss:$0 sm:$0xff]  ;;  %v368_v30 = vld [vmem:[#allocation8 + $0x20] sm:$0xff]  ;;  %v369_v31 = vld [vmem:[#allocation9] sm:$0xff]  ;;  %s471_s30 = scalar_lea.sflag [#allocation5], %s349_s25  ;;  %s878_s10 = sshra.s32 %s484_s23, 4  ;;  %s879_s10 = int_to_ptr.hbm [resolvable:$true] %s878_s10 }
  0x31   : > { %v388_v8 = vmul.f32 %v713_v2, %v358_v0  ;;  %v387_v9 = vmul.f32 %v713_v2, %v357_v3  ;;  %v386_v10 = vmul.f32 %v713_v2, %v356_v5  ;;  %v385_v11 = vmul.f32 %v713_v2, %v355_v7  ;;  %v370_v32 = vld [vmem:[#allocation9 + $0x8] sm:$0xff]  ;;  %v375_v38 = vld [vmem:[#allocation11 + $0x8] sm:$0xff]  ;;  %v372_v43 = vld [vmem:[#allocation9 + $0x18] sm:$0xff]  ;;  %s880_s15 = scalar_lea.hbm %s879_s10, 1  ;;  %s884_s9 = scalar_lea.hbm %s1134_s7, 2 }
  0x32   : > { %v384_v17 = vmul.f32 %v713_v2, %v354_v12  ;;  %v374_v37 = vld [vmem:[#allocation11] sm:$0xff]  ;;  %v371_v39 = vld [vmem:[#allocation9 + $0x10] sm:$0xff]  ;;  %v376_v48 = vld [vmem:[#allocation11 + $0x10] sm:$0xff]  ;;  %p881_p0 = scmp.ne.s32.totalorder %s879_s10, %s880_s15  ;;  %p885_p3 = scmp.lt.s32.totalorder %s879_s10, %s1134_s7 }
  0x33   : > { %v393_v14 = vadd.f32 %v388_v8, %v363_v1  ;;  %v392_v15 = vadd.f32 %v387_v9, %v362_v4  ;;  %v391_v16 = vadd.f32 %v386_v10, %v361_v6  ;;  %v390_v21 = vadd.f32 %v385_v11, %v360_v13  ;;  %v373_v53 = vld [vmem:[#allocation9 + $0x20] sm:$0xff]  ;;  %v378_v59 = vld [vmem:[#allocation11 + $0x20] sm:$0xff]  ;;  %p886_p4 = scmp.lt.s32.totalorder %s884_s9, %s880_s15 }
  0x34   : > { %v389_v23 = vadd.f32 %v384_v17, %v359_v18  ;;  %v377_v55 = vld [vmem:[#allocation11 + $0x18] sm:$0xff]  ;;  %v467_v6 = vstv %s379_s24  ;;  %p882_p1 = pnand %p881_p0, %p1028_p5 }
  0x35   : > { %v398_v19 = vmax.f32 %v393_v14, 0.0  ;;  %v397_v20 = vmax.f32 %v392_v15, 0.0  ;;  %v396_v22 = vmax.f32 %v391_v16, 0.0  ;;  %v395_v24 = vmax.f32 %v390_v21, 0.0  ;;  %p887_p7 = por %p886_p4, %p885_p3 }
  0x36   : > { %v394_v25 = vmax.f32 %v389_v23, 0.0  ;;  %p883_p2 = pneg %p882_p1 }
  0x37   : > { %607 = vmatpush.msra.mxu2 %v398_v19  ;;  %608 = vmatpush.msra.mxu3 %v398_v19 }
  0x38   : > { %426 = vmatpush.msra.mxu0 %v398_v19  ;;  %606 = vmatpush.msra.mxu1 %v398_v19  ;;  %p888_p8 = pnand %p887_p7, %p883_p2 }
  0x39   : > { %610 = vmatpush.msra.mxu2 %v397_v20  ;;  %611 = vmatpush.msra.mxu3 %v397_v20 }
  0x3a   : > { %427 = vmatpush.msra.mxu0 %v397_v20  ;;  %609 = vmatpush.msra.mxu1 %v397_v20 }
  0x3b   : > { %613 = vmatpush.msra.mxu2 %v396_v22  ;;  %614 = vmatpush.msra.mxu3 %v396_v22 }
  0x3c   : > { %428 = vmatpush.msra.mxu0 %v396_v22  ;;  %612 = vmatpush.msra.mxu1 %v396_v22 }
  0x3d   : > { %616 = vmatpush.msra.mxu2 %v395_v24  ;;  %617 = vmatpush.msra.mxu3 %v395_v24 }
  0x3e   : > { %429 = vmatpush.msra.mxu0 %v395_v24  ;;  %615 = vmatpush.msra.mxu1 %v395_v24 }
  0x3f   : > { %619 = vmatpush.msra.mxu2 %v394_v25  ;;  %620 = vmatpush.msra.mxu3 %v394_v25 }
  0x40   : > { %601 = vmatmul.msk.f32.vlgmr.msra.gmra.mxu2 %vm399_vm0, %v366_v26  ;;  %602 = vmatmul.msk.f32.vlgmr.msra.gmra.mxu3 %vm399_vm0, %v367_v27 }
  0x41   : > { %430 = vmatpush.msra.mxu0 %v394_v25  ;;  %618 = vmatpush.msra.mxu1 %v394_v25 }
  0x42   : > { %599 = vmatmul.msk.f32.vlgmr.msra.gmra.mxu0 %vm399_vm0, %v364_v28  ;;  %600 = vmatmul.msk.f32.vlgmr.msra.gmra.mxu1 %vm399_vm0, %v365_v29 }
  0x48   : > { %603 = vmatmul.msk.f32.gmra.mxu3 %vm399_vm0, %v368_v30 }
  0xbf   : > { %v432_v33 = vpop.f32.mrf.mxu0  ;;  %v435_v34 = vpop.f32.mrf.mxu1 }
  0xc0   : > { %v433_v35 = vadd.f32 %v432_v33, %v369_v31  ;;  %v436_v36 = vadd.f32 %v435_v34, %v370_v32 }
  0xc2   : > { %v447_v40 = vmax.f32 %v433_v35, 0.0  ;;  %v448_v41 = vmax.f32 %v436_v36, 0.0 }
  0xc3   : > { %v438_v42 = vpop.f32.mrf.mxu2  ;;  %v441_v44 = vpop.f32.mrf.mxu3 }
  0xc4   : > { %v452_v45 = vmul.f32 %v447_v40, %v374_v37  ;;  %v453_v46 = vmul.f32 %v448_v41, %v375_v38  ;;  %v439_v47 = vadd.f32 %v438_v42, %v371_v39  ;;  %v442_v50 = vadd.f32 %v441_v44, %v372_v43 }
  0xc6   : > { %v449_v49 = vmax.f32 %v439_v47, 0.0  ;;  %v457_v51 = vadd.f32 %v453_v46, %v452_v45  ;;  %v450_v54 = vmax.f32 %v442_v50, 0.0 }
  0xc8   : > { %v454_v52 = vmul.f32 %v449_v49, %v376_v48  ;;  %v455_v60 = vmul.f32 %v450_v54, %v377_v55 }
  0xca   : > { %v458_v57 = vadd.f32 %v457_v51, %v454_v52 }
  0xcb   : > { %v444_v56 = vpop.f32.mrf.mxu3 }
  0xcc   : > { %v445_v58 = vadd.f32 %v444_v56, %v373_v53  ;;  %v459_v62 = vadd.f32 %v458_v57, %v455_v60 }
  0xce   : > { %v451_v61 = vmax.f32 %v445_v58, 0.0 }
  0xd0   : > { %v456_v63 = vmul.f32 %v451_v61, %v378_v59 }
  0xd2   : > { %v460_v0 = vadd.f32 %v459_v62, %v456_v63 }
  0xd4   : > { %v461_v1 = vrot.slane %v460_v0, 4 }
  0xd6   : > { %v462_v2 = vadd.f32 %v461_v1, %v460_v0 }
  0xd8   : > { %v463_v3 = vrot.slane %v462_v2, 2 }
  0xda   : > { %v464_v4 = vadd.f32 %v463_v3, %v462_v2 }
  0xdc   : > { %v465_v5 = vrot.slane %v464_v4, 1 }
  0xde   : > { %v466_v7 = vadd.f32 %v465_v5, %v464_v4 }
  0xe0   : > { %v468_v8 = vadd.f32 %v467_v6, %v466_v7 }
  0xe2   : > { %469 = vst [vmem:[%s350_s22] sm:$0x1] %v468_v8 }
  0xe3   : > { %891 = shalt.err (!%p888_p8)
}
  0xe4   : > { %641 = dma.vmem_to_hbm [thread:$0]  (%p1028_p5), %s482_s17, 16, %s484_s23, %s471_s30  }
  0xe5 PF: > { %p673_p9 = scmp.ge.s32.totalorder %s938_s29, 2  ;;  %s495_s14 = sand.u32 1, %s926_s26  }
  0xe6   : > { %s496_s21 = scalar_lea.sflag [#allocation5], %s495_s14 }
  0xe7   : > { %p660_p10 = pnand %p673_p9, %p1032_p6 }
  0xe9   : > { %p661_p11 = pneg %p660_p10 }
  0xeb   : > { %921 = dma.done.wait (%p661_p11), %s496_s21, 16  }
  0xec   : > { %923 = vsyncadd (%p661_p11), %s496_s21, 4294967280  ;;  %p21_p12 = scmp.ge.s32.totalorder %s1015_s8, 4   ;;  %s1143_s26 = smov %s930_s27 }
  0xed   : > { %s1144_s27 = smov %s934_s28  ;;  %s1145_s28 = smov %s1026_s11 }
  0xee   : > { %s1146_s29 = smov %s1015_s8  ;;  %23 = sbr.rel (!%p21_p12) target bundleno = 10 (0xa), region = 104 }
  0xf3   :  { %501 = vsyncpa [#allocation4], 1 }
  0xf4   :  { %503 = vsyncpa [#allocation4 + $0x1], 1 }
  0xf5   :  { %504 = vsyncpa [#allocation7], 1 }
  0xf6   :  { %505 = vsyncpa [#allocation10], 1 }
  0xf7   :  { %506 = vsyncpa [#allocation5], 1 }
  0xf8   :  { %508 = vsyncpa [#allocation5 + $0x1], 1 }

</bundles_post_ra>
